<compile_context>
chip_gen: v7x
topology: tpu7x:2x2x1
jax: 0.10.0
libtpu: 0.0.40
codegen_flags: <defaults>
</compile_context>

<pallas_src>
from functools import partial

import jax
import jax.numpy as jnp
from jax.experimental import pallas as pl
from jax.experimental.pallas import tpu as pltpu


def _linear_tanh_kernel(x_ref, w_ref, o_ref):
    # x_ref: (B*K,) f32 in SMEM (scalar reads)
    # w_ref: (K+1, N) f32 in VMEM; rows 0..K-1 = W.T, row K = bias
    # o_ref: (B, N)   f32 in VMEM (true output width, no padding)
    kp1, _ = w_ref.shape
    K = kp1 - 1
    B = o_ref.shape[0]
    for b in range(B):                    # static, tiny (B=1)
        acc = w_ref[K:K + 1, :]           # bias row, (1, N)
        for k in range(K):                # static, tiny (K=3): VPU broadcast-FMA
            acc = acc + x_ref[b * K + k] * w_ref[k:k + 1, :]
        o_ref[b:b + 1, :] = jnp.tanh(acc)


def prepare_params(weight, bias):
    """One-time parameter prep (hoisted out of the per-call path).

    weight: (N, K) f32 in PyTorch (out, in) layout; bias: (N,) f32.
    Returns w_t of shape (K+1, N): rows 0..K-1 are weight.T, row K is bias.
    """
    N, K = weight.shape
    w_t = jnp.concatenate(
        [weight.T.astype(jnp.float32),
         bias.astype(jnp.float32).reshape(1, N)],
        axis=0,
    )
    return w_t


@jax.jit
def model_tanh_forward(x, w_t):
    """x: (B, K) f32; w_t: (K+1, N) from prepare_params(). Returns (B, N)."""
    B, K = x.shape
    _, N = w_t.shape
    return pl.pallas_call(
        _linear_tanh_kernel,
        out_shape=jax.ShapeDtypeStruct((B, N), jnp.float32),
        in_specs=[
            pl.BlockSpec(memory_space=pltpu.MemorySpace.SMEM),  # x scalars
            pl.BlockSpec(memory_space=pltpu.MemorySpace.VMEM),  # w_t (+ bias row)
        ],
        out_specs=pl.BlockSpec(memory_space=pltpu.MemorySpace.VMEM),
    )(x.reshape(B * K).astype(jnp.float32), w_t)


if __name__ == "__main__":
    key = jax.random.PRNGKey(0)
    k_x, k_w, k_b = jax.random.split(key, 3)

    B, IN, OUT = 1, 3, 257

    # Deterministic params mimicking torch.nn.Linear default init:
    # uniform(-1/sqrt(in_features), 1/sqrt(in_features))
    bound = 1.0 / (IN ** 0.5)
    weight = jax.random.uniform(k_w, (OUT, IN), jnp.float32, -bound, bound)
    bias = jax.random.uniform(k_b, (OUT,), jnp.float32, -bound, bound)

    x = jax.random.normal(k_x, (B, IN), jnp.float32)

    # One-time weight prep (hoisted out of the forward path).
    w_t = prepare_params(weight, bias)

    y = model_tanh_forward(x, w_t)
    jax.block_until_ready(y)

    # Cross-check against plain JAX reference.
    y_ref = jnp.tanh(x @ weight.T + bias)
    assert y.shape == (B, OUT)
    assert jnp.allclose(y, y_ref, atol=1e-5), "mismatch vs reference"

    print("KERNEL_OK")
</pallas_src>

<mosaic_0001>
module attributes {stable_mosaic.version = 11 : i64} {
  func.func @_linear_tanh_kernel(%arg0: memref<3xf32, #tpu.memory_space<smem>>, %arg1: memref<4x257xf32, #tpu.memory_space<vmem>>, %arg2: memref<1x257xf32, #tpu.memory_space<vmem>>) attributes {dimension_semantics = [], scalar_prefetch = 0 : i64, scratch_operands = 0 : i64, tpu.core_type = #tpu.core_type<tc>} {
    %c3 = arith.constant 3 : index
    %c0 = arith.constant 0 : index
    %0 = vector.load %arg1[%c3, %c0] : memref<4x257xf32, #tpu.memory_space<vmem>>, vector<1x257xf32>
    %c0_0 = arith.constant 0 : index
    %1 = memref.load %arg0[%c0_0] : memref<3xf32, #tpu.memory_space<smem>>
    %c0_1 = arith.constant 0 : index
    %c0_2 = arith.constant 0 : index
    %2 = vector.load %arg1[%c0_1, %c0_2] : memref<4x257xf32, #tpu.memory_space<vmem>>, vector<1x257xf32>
    %3 = vector.broadcast %1 : f32 to vector<1x257xf32>
    %4 = arith.mulf %3, %2 : vector<1x257xf32>
    %5 = arith.addf %0, %4 : vector<1x257xf32>
    %c1 = arith.constant 1 : index
    %6 = memref.load %arg0[%c1] : memref<3xf32, #tpu.memory_space<smem>>
    %c1_3 = arith.constant 1 : index
    %c0_4 = arith.constant 0 : index
    %7 = vector.load %arg1[%c1_3, %c0_4] : memref<4x257xf32, #tpu.memory_space<vmem>>, vector<1x257xf32>
    %8 = vector.broadcast %6 : f32 to vector<1x257xf32>
    %9 = arith.mulf %8, %7 : vector<1x257xf32>
    %10 = arith.addf %5, %9 : vector<1x257xf32>
    %c2 = arith.constant 2 : index
    %11 = memref.load %arg0[%c2] : memref<3xf32, #tpu.memory_space<smem>>
    %c2_5 = arith.constant 2 : index
    %c0_6 = arith.constant 0 : index
    %12 = vector.load %arg1[%c2_5, %c0_6] : memref<4x257xf32, #tpu.memory_space<vmem>>, vector<1x257xf32>
    %13 = vector.broadcast %11 : f32 to vector<1x257xf32>
    %14 = arith.mulf %13, %12 : vector<1x257xf32>
    %15 = arith.addf %10, %14 : vector<1x257xf32>
    %16 = math.tanh %15 : vector<1x257xf32>
    %c0_7 = arith.constant 0 : index
    %c0_8 = arith.constant 0 : index
    %17 = vector.load %arg2[%c0_7, %c0_8] : memref<1x257xf32, #tpu.memory_space<vmem>>, vector<1x257xf32>
    tpu.vector_store %arg2[%c0_7, %c0_8], %16 {strides = array<i32>} : memref<1x257xf32, #tpu.memory_space<vmem>>, vector<1x257xf32>,
    return
  }
}

</mosaic_0001>

<bundles_post_ra>
// kernel: model_tanh_forward.1
= control target key start
LH: loop header
LB: loop body
LE: loop exit
PB: predicated region body
PF: predicated region fallthrough
CT: control target
= control target key end

     0   :  { %7 = vsyncpa [#allocation5], 0  ;;  %s192_s0 = inlined_call_operand.vmem [shape: f32[3], index: 0, kind: input, shape index: {}]   ;;  %s193_s1 = inlined_call_operand.hbm [shape: f32[4,257], index: 1, kind: input, shape index: {}]   ;;  %s194_s2 = inlined_call_operand.hbm [shape: f32[1,257], index: 2, kind: output, shape index: {}]  }
   0x1   :  { %8 = vsyncpa [#allocation3], 0 }
   0x2   :  { %9 = vsyncpa [#allocation4], 0  ;;  %s16_s11 = sshll.u32 %s192_s0, 4  ;;  %s17_s11 = int_to_ptr.vmem [resolvable:$true] %s16_s11 }
   0x3   :  { %s85_s12 = scalar_lea.vmem %s17_s11, 16  ;;  %p90_p1 = scmp.lt.s32.totalorder %s17_s11, %s17_s11 }
   0x4   :  { %p86_p0 = scmp.ne.s32.totalorder %s17_s11, %s85_s12  ;;  %p91_p2 = scmp.lt.s32.totalorder %s85_s12, %s85_s12 }
   0x6   :  { %p92_p3 = por %p91_p2, %p90_p1 }
   0x8   :  { %p93_p4 = pnand %p92_p3, %p86_p0 }
   0xa   :  { %96 = shalt.err (!%p93_p4)
}
   0xb   :  { %s147_s13 = smov [#allocation2]   ;;  %s148_s14 = smov [#allocation6]  }
   0xc   :  { %19 = dma.vmem_to_smem %s17_s11, 16, %s147_s13, [#allocation5]  }
   0xd   :  { %s26_s15 = sshll.u32 %s148_s14, 4  ;;  %s97_s18 = scalar_lea.hbm %s193_s1, 192  ;;  %s27_s15 = int_to_ptr.vmem [resolvable:$true] %s26_s15 }
   0xe   :  { %p98_p5 = scmp.ne.s32.totalorder %s193_s1, %s97_s18  ;;  %p101_p6 = scmp.lt.u32.totalorder %s97_s18, %s193_s1 }
  0x10   :  { %p103_p7 = pnand %p101_p6, %p98_p5 }
  0x12   :  { %106 = shalt.err (!%p103_p7)
}
  0x13   :  { %s107_s22 = scalar_lea.vmem %s27_s15, 192  ;;  %p112_p9 = scmp.lt.s32.totalorder %s27_s15, %s27_s15 }
  0x14   :  { %p108_p8 = scmp.ne.s32.totalorder %s27_s15, %s107_s22  ;;  %p113_p10 = scmp.lt.s32.totalorder %s107_s22, %s107_s22 }
  0x16   :  { %p114_p11 = por %p113_p10, %p112_p9 }
  0x18   :  { %p115_p12 = pnand %p114_p11, %p108_p8 }
  0x1a   :  { %118 = shalt.err (!%p115_p12)
}
  0x1b   :  { %29 = dma.hbm_to_vmem [thread:$0]  %s193_s1, 192, %s27_s15, [#allocation3]  }
  0x1c   :  { %141 = dma.done.wait [#allocation5], 16  }
  0x1d   :  { %142 = vsyncadd [#allocation5], 4294967280 }
  0x1e   :  { %143 = dma.done.wait [#allocation3], 192  }
  0x1f   :  { %144 = vsyncadd [#allocation3], 4294967104 }
  0x20   :  { %36 = sfence }
  0x21   :  { %s39_s25 = sld [smem:[#allocation2]]  ;;  %s78_s26 = sld [smem:[#allocation2 + $0x1]]  ;;  %v40_v0 = vld [vmem:[#allocation6] ss:$4 sm:$0x7]  ;;  %v57_v13 = vlaneseq }
  0x22   :  { %s79_s27 = sld [smem:[#allocation2 + $0x2]]  ;;  %v46_v1 = vld [vmem:[#allocation6 + $0x1] ss:$4 sm:$0x7]  ;;  %s149_s1 = smov [#allocation7]  }
  0x23   :  { %v38_v2 = vld [vmem:[#allocation6 + $0x3] ss:$4 sm:$0x7]  ;;  %v52_v4 = vld [vmem:[#allocation6 + $0x2] ss:$4 sm:$0x7] }
  0x24   :  { %s68_s28 = sshll.u32 %s149_s1, 4  ;;  %vm59_vm0 = vcmp.lt.s32.totalorder %v57_v13, 257  ;;  %s69_s28 = int_to_ptr.vmem [resolvable:$true] %s68_s28 }
  0x25   :  { %s119_s29 = scalar_lea.vmem %s69_s28, 48  ;;  %s123_s30 = scalar_lea.vmem %s69_s28, 64 }
  0x26   :  { %p120_p13 = scmp.ne.s32.totalorder %s69_s28, %s119_s29  ;;  %p124_p0 = scmp.lt.s32.totalorder %s69_s28, %s69_s28 }
  0x27   :  { %v41_v3 = vstv %s39_s25  ;;  %v47_v6 = vstv %s78_s26  ;;  %p125_p1 = scmp.lt.s32.totalorder %s123_s30, %s119_s29 }
  0x28   :  { %v42_v5 = vmul.f32 %v41_v3, %v40_v0  ;;  %v48_v7 = vmul.f32 %v47_v6, %v46_v1  ;;  %v53_v8 = vstv %s79_s27 }
  0x29   :  { %v54_v10 = vmul.f32 %v53_v8, %v52_v4  ;;  %p126_p2 = por %p125_p1, %p124_p0 }
  0x2a   :  { %v43_v9 = vadd.f32 %v42_v5, %v38_v2 }
  0x2b   :  { %p127_p3 = pnand %p126_p2, %p120_p13 }
  0x2c   :  { %v49_v11 = vadd.f32 %v48_v7, %v43_v9 }
  0x2e   :  { %v55_v12 = vadd.f32 %v54_v10, %v49_v11 }
  0x30   :  { %83 = vtanh.f32 %v55_v12 }
  0x3a   :  { %v84_v14 = vpop.eup %83 }
  0x3b   :  { %61 = vst.msk [vmem:[#allocation7] sm:$0x7] %vm59_vm0, %v84_v14 }
  0x3c   :  { %130 = shalt.err (!%p127_p3)
}
  0x3d   :  { %s131_s5 = scalar_lea.hbm %s194_s2, 48 }
  0x3e   :  { %p132_p4 = scmp.ne.s32.totalorder %s194_s2, %s131_s5  ;;  %p135_p5 = scmp.lt.u32.totalorder %s131_s5, %s194_s2 }
  0x40   :  { %p137_p6 = pnand %p135_p5, %p132_p4 }
  0x42   :  { %140 = shalt.err (!%p137_p6)
}
  0x43   :  { %71 = dma.vmem_to_hbm [thread:$0]  %s69_s28, 48, %s194_s2, [#allocation4]  }
  0x44   :  { %145 = dma.done.wait [#allocation4], 48  }
  0x45   :  { %146 = vsyncadd [#allocation4], 4294967248 }
  0x46   :  { %75 = vsyncpa [#allocation3], 1 }
  0x47   :  { %76 = vsyncpa [#allocation4], 1 }
  0x48   :  { %77 = vsyncpa [#allocation5], 1 }

</bundles_post_ra>
